<compile_context>
chip_gen: v5e
topology: v5e:2x2
jax: 0.10.0
libtpu: 0.0.40
codegen_flags: <defaults>
</compile_context>

<pallas_src>
import jax
import jax.numpy as jnp
from jax.experimental import pallas as pl
from jax.experimental.pallas import tpu as pltpu

LANES = 128
MAX_BLOCK_ROWS = 8192      # (8192, 128) f32 = 4 MiB per input per pipeline buffer
CHUNK_ROWS = 512           # in-kernel compute chunk (bounds live temporaries)
ROW_ALIGN = 16             # rows padded to a multiple of 16 (covers bf16 (16,128))


def _chunk_plan(block_rows):
    """Static (offset, size) pieces covering [0, block_rows)."""
    plan = []
    off = 0
    while off < block_rows:
        sz = min(CHUNK_ROWS, block_rows - off)
        plan.append((off, sz))
        off += sz
    return tuple(plan)


def _focal_partials(pred, gt):
    """Fused per-element focal-loss contribution and positive indicator.

    contrib = log(pred)   * (1-pred)^2              if gt == 1
            = log(1-pred) * pred^2 * (1-gt)^4        if gt <  1
            = 0                                      otherwise (padding)
    One shared log per element (branches are mutually exclusive), so the EUP
    sees a single transcendental and the -inf*0 hazard of the two-log
    formulation is avoided. The explicit gt<1 test keeps neutral-padded rows
    out of both branches.
    """
    pos = gt == 1.0
    neg = gt < 1.0
    omp = 1.0 - pred
    omg = 1.0 - gt
    sq = omg * omg
    neg_w = sq * sq                                   # (1 - gt)^4 with two muls
    logx = jnp.log(jnp.where(pos, pred, omp))         # one log per element
    w = jnp.where(pos, omp * omp, jnp.where(neg, pred * pred * neg_w, 0.0))
    contrib = logx * w
    cnt = pos.astype(jnp.float32)
    return contrib, cnt


def _make_kernel(block_rows, num_blocks, chunks, rows_valid, last_partial):
    """Kernel closure over the static tiling parameters."""

    def kernel(pred_ref, gt_ref, loss_ref, cnt_ref):
        i = pl.program_id(0)

        # Init the resident vreg-shaped accumulators once.
        @pl.when(i == 0)
        def _():
            loss_ref[...] = jnp.zeros_like(loss_ref)
            cnt_ref[...] = jnp.zeros_like(cnt_ref)

        def accumulate(masked):
            loss_acc = jnp.zeros((8, LANES), jnp.float32)
            cnt_acc = jnp.zeros((8, LANES), jnp.float32)
            for off, sz in chunks:
                pred = pred_ref[pl.ds(off, sz), :].astype(jnp.float32)
                gt = gt_ref[pl.ds(off, sz), :].astype(jnp.float32)
                if masked:
                    # Only the (statically known) last, partial block runs this
                    # path. Neutralize out-of-range rows BEFORE the log so the
                    # garbage VMEM tail can never produce NaN/Inf.
                    row0 = (num_blocks - 1) * block_rows + off
                    row_ids = row0 + jax.lax.broadcasted_iota(
                        jnp.int32, (sz, LANES), 0)
                    valid = row_ids < rows_valid
                    pred = jnp.where(valid, pred, 0.0)
                    gt = jnp.where(valid, gt, 0.0)
                contrib, cnt = _focal_partials(pred, gt)
                # Reduce the (sz,128) chunk to one (8,128) vreg with pure VPU
                # adds over the leading (tile) axis -- no XLU, no masked store.
                loss_acc = loss_acc + jnp.sum(
                    contrib.reshape(sz // 8, 8, LANES), axis=0)
                cnt_acc = cnt_acc + jnp.sum(
                    cnt.reshape(sz // 8, 8, LANES), axis=0)
            loss_ref[...] += loss_acc
            cnt_ref[...] += cnt_acc

        if not last_partial:
            accumulate(masked=False)
        else:
            last = pl.num_programs(0) - 1

            @pl.when(i != last)
            def _():
                accumulate(masked=False)

            @pl.when(i == last)
            def _():
                accumulate(masked=True)

    return kernel


@jax.jit
def focal_loss(pred, gt):
    """CornerNet focal loss. pred, gt: (B, C, H, W); pred in (0, 1)."""
    assert pred.shape == gt.shape
    n = int(pred.size)

    def _prep(x):
        # Keep narrow floating dtypes (bf16) -- halves HBM traffic and avoids a
        # full-tensor cast pass; upcast happens per-chunk inside the kernel.
        if x.dtype not in (jnp.float32, jnp.bfloat16):
            x = x.astype(jnp.float32)
        return x.reshape(-1)

    pred_flat = _prep(pred)
    gt_flat = _prep(gt)

    align = ROW_ALIGN * LANES
    padded_n = pl.cdiv(n, align) * align
    if padded_n != n:
        # Rare fallback: pad the tail with neutral values (pred=0, gt=0 => the
        # fused formula contributes exactly 0 and counts no positives).
        pad = padded_n - n
        pred_flat = jnp.pad(pred_flat, (0, pad))
        gt_flat = jnp.pad(gt_flat, (0, pad))

    rows = padded_n // LANES
    pred2d = pred_flat.reshape(rows, LANES)     # lane-dense, free reshape
    gt2d = gt_flat.reshape(rows, LANES)

    block_rows = rows if rows <= MAX_BLOCK_ROWS else MAX_BLOCK_ROWS
    num_blocks = pl.cdiv(rows, block_rows)
    last_partial = (num_blocks * block_rows) != rows

    kernel = _make_kernel(block_rows, num_blocks, _chunk_plan(block_rows),
                          rows, last_partial)

    acc_shape = jax.ShapeDtypeStruct((8, LANES), jnp.float32)
    acc_spec = pl.BlockSpec((8, LANES), lambda i: (0, 0))

    loss_acc, cnt_acc = pl.pallas_call(
        kernel,
        out_shape=(acc_shape, acc_shape),
        grid_spec=pltpu.PrefetchScalarGridSpec(
            num_scalar_prefetch=0,
            grid=(num_blocks,),
            in_specs=[
                pl.BlockSpec((block_rows, LANES), lambda i: (i, 0)),
                pl.BlockSpec((block_rows, LANES), lambda i: (i, 0)),
            ],
            out_specs=[acc_spec, acc_spec],
        ),
        compiler_params=pltpu.CompilerParams(
            dimension_semantics=("arbitrary",),
            vmem_limit_bytes=40 * 1024 * 1024),
    )(pred2d, gt2d)

    # Tiny final cross-lane/cross-sublane reduction in JAX (2 x 8 x 128 floats).
    total = jnp.sum(loss_acc)
    num_pos = jnp.sum(cnt_acc)
    # loss = -neg_loss when num_pos == 0, else -(pos+neg)/num_pos. Since the
    # positive contribution is exactly 0 when there are no positives, a single
    # max(num_pos, 1) denominator reproduces both cases.
    return -total / jnp.maximum(num_pos, 1.0)


def _reference_focal_loss(pred, gt):
    pred = pred.astype(jnp.float32)
    gt = gt.astype(jnp.float32)
    pos_inds = (gt == 1.0).astype(jnp.float32)
    neg_inds = (gt < 1.0).astype(jnp.float32)
    neg_weights = (1.0 - gt) ** 4
    pos_loss = jnp.log(pred) * (1.0 - pred) ** 2 * pos_inds
    neg_loss = jnp.log(1.0 - pred) * pred ** 2 * neg_weights * neg_inds
    num_pos = pos_inds.sum()
    pos_loss = pos_loss.sum()
    neg_loss = neg_loss.sum()
    return jnp.where(num_pos == 0.0,
                     -neg_loss,
                     -(pos_loss + neg_loss) /
                     jnp.where(num_pos == 0.0, 1.0, num_pos))


if __name__ == "__main__":
    key = jax.random.PRNGKey(0)
    k_pred, k_gt, k_pos = jax.random.split(key, 3)

    B, C, H, W = 2, 4, 16, 16

    # pred: strictly in (0, 1) via sigmoid (as a heatmap head would produce).
    pred = jax.nn.sigmoid(jax.random.normal(k_pred, (B, C, H, W),
                                            dtype=jnp.float32))
    # gt: gaussian-ish values in [0, 1) with a few exact 1.0 "peak" entries.
    gt = jax.random.uniform(k_gt, (B, C, H, W), dtype=jnp.float32,
                            minval=0.0, maxval=0.99)
    peak_mask = jax.random.uniform(k_pos, (B, C, H, W)) < 0.02
    gt = jnp.where(peak_mask, 1.0, gt)

    loss = focal_loss(pred, gt)
    jax.block_until_ready(loss)

    ref = _reference_focal_loss(pred, gt)
    if not jnp.allclose(loss, ref, rtol=1e-4, atol=1e-5):
        raise AssertionError(f"mismatch: pallas={loss} ref={ref}")

    print("KERNEL_OK")
</pallas_src>

<mosaic_0001>
module attributes {stable_mosaic.version = 11 : i64} {
  func.func @kernel(%arg0: i32, %arg1: memref<16x128xf32, #tpu.memory_space<vmem>>, %arg2: memref<16x128xf32, #tpu.memory_space<vmem>>, %arg3: memref<8x128xf32, #tpu.memory_space<vmem>>, %arg4: memref<8x128xf32, #tpu.memory_space<vmem>>) attributes {dimension_semantics = [#tpu.dimension_semantics<arbitrary>], iteration_bounds = array<i64: 1>, scalar_prefetch = 0 : i64, scratch_operands = 0 : i64, tpu.core_type = #tpu.core_type<tc>, window_params = [{transform_indices = @transform_0, window_bounds = array<i64: 16, 128>}, {transform_indices = @transform_1, window_bounds = array<i64: 16, 128>}, {pipeline_mode = #tpu.pipeline_mode<synchronous>, transform_indices = @transform_2, window_bounds = array<i64: 8, 128>}, {pipeline_mode = #tpu.pipeline_mode<synchronous>, transform_indices = @transform_3, window_bounds = array<i64: 8, 128>}]} {
    %c0_i32 = arith.constant 0 : i32
    %0 = arith.cmpi eq, %arg0, %c0_i32 : i32
    %1 = arith.extui %0 : i1 to i32
    %c0_i32_0 = arith.constant 0 : i32
    %2 = arith.cmpi ne, %1, %c0_i32_0 : i32
    scf.if %2 {
      %cst_20 = arith.constant 0.000000e+00 : f32
      %40 = vector.broadcast %cst_20 : f32 to vector<8x128xf32>
      %c0_21 = arith.constant 0 : index
      %c0_22 = arith.constant 0 : index
      %41 = vector.load %arg3[%c0_21, %c0_22] : memref<8x128xf32, #tpu.memory_space<vmem>>, vector<8x128xf32>
      tpu.vector_store %arg3[%c0_21, %c0_22], %40 {strides = array<i32>} : memref<8x128xf32, #tpu.memory_space<vmem>>, vector<8x128xf32>,
      %cst_23 = arith.constant 0.000000e+00 : f32
      %42 = vector.broadcast %cst_23 : f32 to vector<8x128xf32>
      %c0_24 = arith.constant 0 : index
      %c0_25 = arith.constant 0 : index
      %43 = vector.load %arg4[%c0_24, %c0_25] : memref<8x128xf32, #tpu.memory_space<vmem>>, vector<8x128xf32>
      tpu.vector_store %arg4[%c0_24, %c0_25], %42 {strides = array<i32>} : memref<8x128xf32, #tpu.memory_space<vmem>>, vector<8x128xf32>,
    } else {
    }
    %cst = arith.constant 0.000000e+00 : f32
    %3 = vector.broadcast %cst : f32 to vector<8x128xf32>
    %cst_1 = arith.constant 0.000000e+00 : f32
    %4 = vector.broadcast %cst_1 : f32 to vector<8x128xf32>
    %c0 = arith.constant 0 : index
    %c0_2 = arith.constant 0 : index
    %5 = vector.load %arg1[%c0, %c0_2] : memref<16x128xf32, #tpu.memory_space<vmem>>, vector<16x128xf32>
    %c0_3 = arith.constant 0 : index
    %c0_4 = arith.constant 0 : index
    %6 = vector.load %arg2[%c0_3, %c0_4] : memref<16x128xf32, #tpu.memory_space<vmem>>, vector<16x128xf32>
    %cst_5 = arith.constant 1.000000e+00 : f32
    %7 = vector.broadcast %cst_5 : f32 to vector<16x128xf32>
    %8 = arith.cmpf oeq, %6, %7 : vector<16x128xf32>
    %cst_6 = arith.constant 1.000000e+00 : f32
    %9 = vector.broadcast %cst_6 : f32 to vector<16x128xf32>
    %10 = arith.cmpf olt, %6, %9 : vector<16x128xf32>
    %cst_7 = arith.constant 1.000000e+00 : f32
    %11 = vector.broadcast %cst_7 : f32 to vector<16x128xf32>
    %12 = arith.subf %11, %5 : vector<16x128xf32>
    %cst_8 = arith.constant 1.000000e+00 : f32
    %13 = vector.broadcast %cst_8 : f32 to vector<16x128xf32>
    %14 = arith.subf %13, %6 : vector<16x128xf32>
    %15 = arith.mulf %14, %14 : vector<16x128xf32>
    %16 = arith.mulf %15, %15 : vector<16x128xf32>
    %17 = arith.select %8, %5, %12 : vector<16x128xi1>, vector<16x128xf32>
    %18 = math.log %17 : vector<16x128xf32>
    %19 = arith.mulf %12, %12 : vector<16x128xf32>
    %20 = arith.mulf %5, %5 : vector<16x128xf32>
    %21 = arith.mulf %20, %16 : vector<16x128xf32>
    %cst_9 = arith.constant 0.000000e+00 : f32
    %22 = vector.broadcast %cst_9 : f32 to vector<16x128xf32>
    %23 = arith.select %10, %21, %22 : vector<16x128xi1>, vector<16x128xf32>
    %24 = arith.select %8, %19, %23 : vector<16x128xi1>, vector<16x128xf32>
    %25 = arith.mulf %18, %24 : vector<16x128xf32>
    %26 = arith.extui %8 : vector<16x128xi1> to vector<16x128xi32>
    %27 = arith.sitofp %26 : vector<16x128xi32> to vector<16x128xf32>
    %28 = vector.shape_cast %25 : vector<16x128xf32> to vector<2x8x128xf32>
    %cst_10 = arith.constant dense<0.000000e+00> : vector<8x128xf32>
    %29 = vector.multi_reduction <add>, %28, %cst_10 [0] : vector<2x8x128xf32> to vector<8x128xf32>
    %30 = arith.addf %3, %29 : vector<8x128xf32>
    %31 = vector.shape_cast %27 : vector<16x128xf32> to vector<2x8x128xf32>
    %cst_11 = arith.constant dense<0.000000e+00> : vector<8x128xf32>
    %32 = vector.multi_reduction <add>, %31, %cst_11 [0] : vector<2x8x128xf32> to vector<8x128xf32>
    %33 = arith.addf %4, %32 : vector<8x128xf32>
    %c0_12 = arith.constant 0 : index
    %c0_13 = arith.constant 0 : index
    %34 = vector.load %arg3[%c0_12, %c0_13] : memref<8x128xf32, #tpu.memory_space<vmem>>, vector<8x128xf32>
    %35 = arith.addf %34, %30 : vector<8x128xf32>
    %c0_14 = arith.constant 0 : index
    %c0_15 = arith.constant 0 : index
    %36 = vector.load %arg3[%c0_14, %c0_15] : memref<8x128xf32, #tpu.memory_space<vmem>>, vector<8x128xf32>
    tpu.vector_store %arg3[%c0_14, %c0_15], %35 {strides = array<i32>} : memref<8x128xf32, #tpu.memory_space<vmem>>, vector<8x128xf32>,
    %c0_16 = arith.constant 0 : index
    %c0_17 = arith.constant 0 : index
    %37 = vector.load %arg4[%c0_16, %c0_17] : memref<8x128xf32, #tpu.memory_space<vmem>>, vector<8x128xf32>
    %38 = arith.addf %37, %33 : vector<8x128xf32>
    %c0_18 = arith.constant 0 : index
    %c0_19 = arith.constant 0 : index
    %39 = vector.load %arg4[%c0_18, %c0_19] : memref<8x128xf32, #tpu.memory_space<vmem>>, vector<8x128xf32>
    tpu.vector_store %arg4[%c0_18, %c0_19], %38 {strides = array<i32>} : memref<8x128xf32, #tpu.memory_space<vmem>>, vector<8x128xf32>,
    return
  }
  func.func @transform_0(%arg0: i32) -> (i32, i32) {
    %c0_i32 = arith.constant 0 : i32
    %c0_i32_0 = arith.constant 0 : i32
    return %arg0, %c0_i32 : i32, i32
  }
  func.func @transform_1(%arg0: i32) -> (i32, i32) {
    %c0_i32 = arith.constant 0 : i32
    %c0_i32_0 = arith.constant 0 : i32
    return %arg0, %c0_i32 : i32, i32
  }
  func.func @transform_2(%arg0: i32) -> (i32, i32) {
    %c0_i32 = arith.constant 0 : i32
    %c0_i32_0 = arith.constant 0 : i32
    %c0_i32_1 = arith.constant 0 : i32
    return %c0_i32, %c0_i32_0 : i32, i32
  }
  func.func @transform_3(%arg0: i32) -> (i32, i32) {
    %c0_i32 = arith.constant 0 : i32
    %c0_i32_0 = arith.constant 0 : i32
    %c0_i32_1 = arith.constant 0 : i32
    return %c0_i32, %c0_i32_0 : i32, i32
  }
}

</mosaic_0001>

<bundles_post_ra>
// kernel: focal_loss.1
= control target key start
LH: loop header
LB: loop body
LE: loop exit
PB: predicated region body
PF: predicated region fallthrough
CT: control target
= control target key end

     0   :  { %v82_v14 = vmov 0.0   ;;  %s127_s0 = inlined_call_operand.vmem [shape: f32[16,128], index: 0, kind: input, shape index: {}]   ;;  %s128_s1 = inlined_call_operand.vmem [shape: f32[16,128], index: 1, kind: input, shape index: {}]   ;;  %s129_s3 = inlined_call_operand.vmem [shape: f32[8,128], index: 3, kind: output, shape index: {1}]   ;;  %s130_s2 = inlined_call_operand.vmem [shape: f32[8,128], index: 2, kind: output, shape index: {0}]  }
   0x1   :  { %v19_v0 = vld [vmem:[%s127_s0] sm:$0xff]  ;;  %v20_v1 = vld [vmem:[%s127_s0 + $0x8] sm:$0xff] }
   0x2   :  { %v21_v2 = vld [vmem:[%s128_s1] sm:$0xff]  ;;  %v22_v3 = vld [vmem:[%s128_s1 + $0x8] sm:$0xff]  ;;  %v27_v4 = vsub.f32 1.0, %v19_v0  ;;  %v28_v5 = vsub.f32 1.0, %v20_v1  ;;  %v43_v12 = vmul.f32 %v19_v0, %v19_v0  ;;  %v44_v13 = vmul.f32 %v20_v1, %v20_v1 }
   0x3   :  { %vm23_vm0 = vcmp.eq.f32.partialorder %v21_v2, 1.0  ;;  %vm24_vm1 = vcmp.eq.f32.partialorder %v22_v3, 1.0  ;;  %v29_v6 = vsub.f32 1.0, %v21_v2  ;;  %v30_v7 = vsub.f32 1.0, %v22_v3 }
   0x4   :  { %v35_v8 = vsel %vm23_vm0, %v19_v0, %v27_v4  ;;  %v36_v9 = vsel %vm24_vm1, %v20_v1, %v28_v5  ;;  %v75_v15 = vsel %vm23_vm0, 1.0, %v82_v14  ;;  %v76_v16 = vsel %vm24_vm1, 1.0, %v82_v14 }
   0x5   :  { %v31_v10 = vmul.f32 %v29_v6, %v29_v6  ;;  %v32_v11 = vmul.f32 %v30_v7, %v30_v7  ;;  %78 = vlog2.f32 %v35_v8  ;;  %v59_v19 = vadd.f32 %v76_v16, %v75_v15 }
   0x6   :  { %80 = vlog2.f32 %v36_v9  ;;  %vm25_vm2 = vcmp.lt.f32.partialorder %v21_v2, 1.0  ;;  %vm26_vm3 = vcmp.lt.f32.partialorder %v22_v3, 1.0  ;;  %v41_v20 = vmul.f32 %v27_v4, %v27_v4 }
   0x7   :  { %v33_v17 = vmul.f32 %v31_v10, %v31_v10  ;;  %v34_v18 = vmul.f32 %v32_v11, %v32_v11  ;;  %v42_v21 = vmul.f32 %v28_v5, %v28_v5  ;;  %66 = vst [vmem:[%s129_s3] sm:$0xff] %v59_v19 }
   0x9   :  { %v45_v22 = vmul.f32 %v43_v12, %v33_v17  ;;  %v46_v23 = vmul.f32 %v44_v13, %v34_v18 }
   0xb   :  { %v79_v24 = vpop.eup %78  ;;  %v47_v25 = vsel %vm25_vm2, %v45_v22, 0.0  ;;  %v48_v26 = vsel %vm26_vm3, %v46_v23, 0.0 }
   0xc   :  { %v81_v27 = vpop.eup %80  ;;  %v38_v28 = vmul.f32 0.6931472, %v79_v24  ;;  %v49_v29 = vsel %vm23_vm0, %v41_v20, %v47_v25  ;;  %v50_v30 = vsel %vm24_vm1, %v42_v21, %v48_v26 }
   0xd   :  { %v40_v31 = vmul.f32 0.6931472, %v81_v27 }
   0xe   :  { %v51_v32 = vmul.f32 %v49_v29, %v38_v28 }
   0xf   :  { %v52_v33 = vmul.f32 %v50_v30, %v40_v31 }
  0x11   :  { %v57_v34 = vadd.f32 %v52_v33, %v51_v32 }
  0x13   :  { %63 = vst [vmem:[%s130_s2] sm:$0xff] %v57_v34 }

</bundles_post_ra>
